<compile_context>
chip_gen: v5e
topology: v5e:2x2
jax: 0.10.0
libtpu: 0.0.40
codegen_flags: <defaults>
</compile_context>

<pallas_src>
from functools import lru_cache

import numpy as np
import jax
import jax.numpy as jnp
from jax import lax
from jax.experimental import pallas as pl
from jax.experimental.pallas import tpu as pltpu

B, C, H, W = 2, 4, 16, 16
HW = H * W
BC = B * C
K_LIST = (2,)
NK = len(K_LIST)
NUM_CONV = NK + 1               # one conv per k + one for the low-freq residual
KS = 3                          # spatial_kernel
PAD = KS // 2
CK2 = C * KS * KS               # 36


def _lowpass_operator(h, w, freq):
    """Right-multiply operator P (hw x hw) such that, for row-major flattened x,
       x_flat @ P == Re(ifft2(ifftshift(Re(fftshift(fft2(x,'ortho'))) * mask),'ortho')).
    """
    FH = np.fft.fft(np.eye(h), axis=0, norm='ortho')        # ortho DFT matrix (h,h)
    FW = np.fft.fft(np.eye(w), axis=0, norm='ortho')        # ortho DFT matrix (w,w)
    D = np.kron(FH, FW)                                     # 2-D DFT on row-major flatten
    Dinv = np.conj(D).T                                     # unitary inverse
    mask = np.zeros((h, w), np.float64)
    mask[round(h / 2 - h / (2 * freq)):round(h / 2 + h / (2 * freq)),
         round(w / 2 - w / (2 * freq)):round(w / 2 + w / (2 * freq))] = 1.0
    m = np.fft.ifftshift(mask).reshape(-1)                  # mask in raw DFT order
    P = np.real(Dinv) @ (m[:, None] * np.real(D))           # acts on column vectors
    return np.ascontiguousarray(P.T).astype(np.float32)     # right-multiply form


@lru_cache(maxsize=None)
def _fused_lowpass_operators(h, w, freqs):
    """All low-pass operators fused along the lane axis: (h*w, NK*h*w)."""
    return np.concatenate([_lowpass_operator(h, w, f) for f in freqs], axis=1)


def _freq_select_kernel(x_ref, pat_ref, p_ref, w_ref, o_ref):
    # x_ref:   (B*C, HW)          f32   flattened images, lane-dense
    # pat_ref: (CK2+1, B*HW)      f32   im2col patches of att (+ ones row for bias)
    # p_ref:   (HW, NK*HW)        bf16  fused low-pass right-operators
    # w_ref:   (NUM_CONV, CK2+1)  f32   conv weights with bias folded as last column
    # o_ref:   (B*C, HW)          f32
    x = x_ref[...]

    # All NUM_CONV 3x3 "attention" convs (+ bias) as ONE MXU matmul over im2col.
    conv = jnp.dot(w_ref[...], pat_ref[...],
                   preferred_element_type=jnp.float32)       # (NUM_CONV, B*HW)

    # All NK low-pass operators as ONE 256-wide-contraction MXU matmul.
    low_all = jnp.dot(x, p_ref[...].astype(jnp.float32),
                      preferred_element_type=jnp.float32)    # (B*C, NK*HW)

    def gate(row):
        # (1, B*HW) -> (B*C, HW): lane-aligned per-batch slice, sublane-broadcast
        # over the C channels of that batch (spatial_group == 1).
        return jnp.concatenate(
            [jnp.broadcast_to(row[:, b * HW:(b + 1) * HW], (C, HW))
             for b in range(B)], axis=0)

    pre = x
    acc = jnp.zeros((BC, HW), jnp.float32)
    for idx in range(NK):
        low = low_all[:, idx * HW:(idx + 1) * HW]
        fw = jax.nn.sigmoid(conv[idx:idx + 1, :]) * 2.0      # sp_act on (1, B*HW)
        acc = acc + gate(fw) * (pre - low)                   # high band
        pre = low
    # lowfreq_att branch: RAW conv output (no sp_act) gates the remaining low band.
    acc = acc + gate(conv[NK:NK + 1, :]) * pre

    # single lane/sublane-dense unmasked store of the whole (8, 256) tile
    o_ref[...] = acc


@jax.jit
def frequency_selection(x, att_feat, conv_w, conv_b):
    assert x.shape == (B, C, H, W)
    x_flat = x.reshape(BC, HW).astype(jnp.float32)

    # glue (fused under this jit): im2col of the attention features (zero pad 1),
    # feature order (c, kh, kw) to match the flattened conv weights.
    att_pad = jnp.pad(att_feat.astype(jnp.float32),
                      ((0, 0), (0, 0), (PAD, PAD), (PAD, PAD)))
    cols = [att_pad[:, :, kh:kh + H, kw:kw + W]
            for kh in range(KS) for kw in range(KS)]          # each (B, C, H, W)
    pat = jnp.stack(cols, axis=2).reshape(B, CK2, HW)         # (B, 36, 256)
    ones = jnp.ones((B, 1, HW), jnp.float32)
    pat = jnp.concatenate([pat, ones], axis=1)                # (B, 37, 256) bias row
    patT = jnp.transpose(pat, (1, 0, 2)).reshape(CK2 + 1, B * HW)   # (37, 512)

    # conv weights with bias folded as an extra column.
    w_mat = conv_w[:, 0].reshape(NUM_CONV, CK2).astype(jnp.float32)
    w_aug = jnp.concatenate(
        [w_mat, conv_b.astype(jnp.float32)[:, None]], axis=1)        # (2, 37)

    # compile-time constant (lru_cache host build, embedded by jit), bf16 storage.
    p_fused = jnp.asarray(_fused_lowpass_operators(H, W, K_LIST),
                          dtype=jnp.bfloat16)                         # (256, NK*256)

    out_flat = pl.pallas_call(
        _freq_select_kernel,
        out_shape=jax.ShapeDtypeStruct((BC, HW), jnp.float32),
        in_specs=[
            pl.BlockSpec(memory_space=pltpu.MemorySpace.VMEM),   # x_flat
            pl.BlockSpec(memory_space=pltpu.MemorySpace.VMEM),   # patches^T (+ ones)
            pl.BlockSpec(memory_space=pltpu.MemorySpace.VMEM),   # fused P operator
            pl.BlockSpec(memory_space=pltpu.MemorySpace.VMEM),   # conv weights (+ bias)
        ],
        out_specs=pl.BlockSpec(memory_space=pltpu.MemorySpace.VMEM),
    )(x_flat, patT, p_fused, w_aug)
    return out_flat.reshape(B, C, H, W)


def _reference(x, att, conv_w, conv_b):
    """Pure-JAX mirror of the PyTorch forward (incl. the complex->real cast)."""
    b, c, h, w = x.shape
    x_fft = jnp.real(jnp.fft.fftshift(jnp.fft.fft2(x, norm='ortho'))).astype(x.dtype)

    def conv(idx):
        y = lax.conv_general_dilated(att, conv_w[idx], (1, 1),
                                     ((PAD, PAD), (PAD, PAD)),
                                     dimension_numbers=('NCHW', 'OIHW', 'NCHW'))
        return y + conv_b[idx]

    pre = x
    out = jnp.zeros_like(x)
    for idx, freq in enumerate(K_LIST):
        mask = np.zeros((1, 1, h, w), np.float32)
        mask[:, :, round(h / 2 - h / (2 * freq)):round(h / 2 + h / (2 * freq)),
             round(w / 2 - w / (2 * freq)):round(w / 2 + w / (2 * freq))] = 1.0
        low = jnp.real(jnp.fft.ifft2(jnp.fft.ifftshift(x_fft * mask),
                                     norm='ortho')).astype(x.dtype)
        high = pre - low
        pre = low
        fw = jax.nn.sigmoid(conv(idx)) * 2.0
        out = out + fw * high
    out = out + conv(NK) * pre     # lowfreq_att: no sp_act
    return out


if __name__ == "__main__":
    key = jax.random.PRNGKey(0)
    kx, kw, kb = jax.random.split(key, 3)
    x = jax.random.normal(kx, (B, C, H, W), jnp.float32)
    # Deterministic synthetic parameters.  (The module's init='zero' would zero
    # the conv weights; small random values are used so the conv path is
    # actually exercised.)
    conv_w = 0.1 * jax.random.normal(kw, (NUM_CONV, 1, C, KS, KS), jnp.float32)
    conv_b = 0.1 * jax.random.normal(kb, (NUM_CONV,), jnp.float32)

    out = frequency_selection(x, x, conv_w, conv_b)    # att_feat=None -> att=x
    out = jax.block_until_ready(out)

    ref = jax.block_until_ready(_reference(x, x, conv_w, conv_b))
    max_err = float(jnp.max(jnp.abs(out - ref)))
    assert np.allclose(np.asarray(out), np.asarray(ref),
                       atol=1e-2, rtol=1e-2), max_err
    print("KERNEL_OK")
</pallas_src>

<mosaic_0001>
module attributes {stable_mosaic.version = 11 : i64} {
  func.func @_freq_select_kernel(%arg0: memref<8x256xf32, #tpu.memory_space<vmem>>, %arg1: memref<37x512xf32, #tpu.memory_space<vmem>>, %arg2: memref<256x256xbf16, #tpu.memory_space<vmem>>, %arg3: memref<2x37xf32, #tpu.memory_space<vmem>>, %arg4: memref<8x256xf32, #tpu.memory_space<vmem>>) attributes {dimension_semantics = [], scalar_prefetch = 0 : i64, scratch_operands = 0 : i64, tpu.core_type = #tpu.core_type<tc>} {
    %c0 = arith.constant 0 : index
    %c0_0 = arith.constant 0 : index
    %0 = vector.load %arg0[%c0, %c0_0] : memref<8x256xf32, #tpu.memory_space<vmem>>, vector<8x256xf32>
    %c0_1 = arith.constant 0 : index
    %c0_2 = arith.constant 0 : index
    %1 = vector.load %arg3[%c0_1, %c0_2] : memref<2x37xf32, #tpu.memory_space<vmem>>, vector<2x37xf32>
    %c0_3 = arith.constant 0 : index
    %c0_4 = arith.constant 0 : index
    %2 = vector.load %arg1[%c0_3, %c0_4] : memref<37x512xf32, #tpu.memory_space<vmem>>, vector<37x512xf32>
    %cst = arith.constant dense<0.000000e+00> : vector<2x512xf32>
    %3 = tpu.matmul %1, %2, %cst {dimension_numbers = #tpu.dot_dimension_numbers<[1], [0], [0], [1], [0, 0, 1, 1], [], []>} : vector<2x37xf32>, vector<37x512xf32>, vector<2x512xf32> -> vector<2x512xf32>
    %c0_5 = arith.constant 0 : index
    %c0_6 = arith.constant 0 : index
    %4 = vector.load %arg2[%c0_5, %c0_6] : memref<256x256xbf16, #tpu.memory_space<vmem>>, vector<256x256xbf16>
    %5 = arith.extf %4 : vector<256x256xbf16> to vector<256x256xf32>
    %cst_7 = arith.constant dense<0.000000e+00> : vector<8x256xf32>
    %6 = tpu.matmul %0, %5, %cst_7 {dimension_numbers = #tpu.dot_dimension_numbers<[1], [0], [0], [1], [0, 0, 1, 1], [], []>} : vector<8x256xf32>, vector<256x256xf32>, vector<8x256xf32> -> vector<8x256xf32>
    %cst_8 = arith.constant 0.000000e+00 : f32
    %7 = vector.broadcast %cst_8 : f32 to vector<8x256xf32>
    %8 = vector.extract_strided_slice %3 {offsets = [0, 0], sizes = [1, 512], strides = [1, 1]} : vector<2x512xf32> to vector<1x512xf32>
    %9 = arith.negf %8 : vector<1x512xf32>
    %10 = math.exp %9 : vector<1x512xf32>
    %cst_9 = arith.constant 1.000000e+00 : f32
    %11 = vector.broadcast %cst_9 : f32 to vector<1x512xf32>
    %12 = arith.addf %11, %10 : vector<1x512xf32>
    %13 = arith.divf %11, %12 : vector<1x512xf32>
    %cst_10 = arith.constant 2.000000e+00 : f32
    %14 = vector.broadcast %cst_10 : f32 to vector<1x512xf32>
    %15 = arith.mulf %13, %14 : vector<1x512xf32>
    %16 = vector.extract_strided_slice %15 {offsets = [0, 0], sizes = [1, 256], strides = [1, 1]} : vector<1x512xf32> to vector<1x256xf32>
    %17 = vector.shape_cast %16 : vector<1x256xf32> to vector<1x256xf32>
    %18 = vector.broadcast %17 : vector<1x256xf32> to vector<4x256xf32>
    %19 = vector.extract_strided_slice %15 {offsets = [0, 256], sizes = [1, 256], strides = [1, 1]} : vector<1x512xf32> to vector<1x256xf32>
    %20 = vector.shape_cast %19 : vector<1x256xf32> to vector<1x256xf32>
    %21 = vector.broadcast %20 : vector<1x256xf32> to vector<4x256xf32>
    %22 = tpu.concatenate %18, %21 in 0 : vector<4x256xf32>, vector<4x256xf32> -> vector<8x256xf32>
    %23 = arith.subf %0, %6 : vector<8x256xf32>
    %24 = arith.mulf %22, %23 : vector<8x256xf32>
    %25 = arith.addf %7, %24 : vector<8x256xf32>
    %26 = vector.extract_strided_slice %3 {offsets = [1, 0], sizes = [1, 512], strides = [1, 1]} : vector<2x512xf32> to vector<1x512xf32>
    %27 = vector.extract_strided_slice %26 {offsets = [0, 0], sizes = [1, 256], strides = [1, 1]} : vector<1x512xf32> to vector<1x256xf32>
    %28 = vector.shape_cast %27 : vector<1x256xf32> to vector<1x256xf32>
    %29 = vector.broadcast %28 : vector<1x256xf32> to vector<4x256xf32>
    %30 = vector.extract_strided_slice %26 {offsets = [0, 256], sizes = [1, 256], strides = [1, 1]} : vector<1x512xf32> to vector<1x256xf32>
    %31 = vector.shape_cast %30 : vector<1x256xf32> to vector<1x256xf32>
    %32 = vector.broadcast %31 : vector<1x256xf32> to vector<4x256xf32>
    %33 = tpu.concatenate %29, %32 in 0 : vector<4x256xf32>, vector<4x256xf32> -> vector<8x256xf32>
    %34 = arith.mulf %33, %6 : vector<8x256xf32>
    %35 = arith.addf %25, %34 : vector<8x256xf32>
    %c0_11 = arith.constant 0 : index
    %c0_12 = arith.constant 0 : index
    %36 = vector.load %arg4[%c0_11, %c0_12] : memref<8x256xf32, #tpu.memory_space<vmem>>, vector<8x256xf32>
    tpu.vector_store %arg4[%c0_11, %c0_12], %35 {strides = array<i32>} : memref<8x256xf32, #tpu.memory_space<vmem>>, vector<8x256xf32>,
    return
  }
}

</mosaic_0001>

<bundles_post_ra>
// kernel: squeeze.1
= control target key start
LH: loop header
LB: loop body
LE: loop exit
PB: predicated region body
PF: predicated region fallthrough
CT: control target
= control target key end

     0   :  { %vm37_vm0 = vcmask 1041409   ;;  %s176_s22 = smov 27   ;;  %s177_s23 = smov 21   ;;  %vm39_vm1 = vcmask 23552   ;;  %vm49_vm2 = vcmask 294152   ;;  %vm59_vm3 = vcmask 269552   ;;  %s235_s0 = inlined_call_operand.vmem [shape: f32[2,1,4,3,3], index: 0, kind: input, shape index: {}]   ;;  %s236_s1 = inlined_call_operand.vmem [shape: f32[2,36], index: 1, kind: output, shape index: {}]  }
   0x1   :  { %v157_v0 = vld [vmem:[%s235_s0 + $0x1c] sm:$0xf]  ;;  %v161_v1 = vld [vmem:[%s235_s0 + $0xc] sm:$0xf]  ;;  %v158_v2 = vld [vmem:[%s235_s0 + $0x18] sm:$0xf] }
   0x2   :  { %7 = vst [vmem:[#allocation1 + $0x38] sm:$0xf] %v157_v0  ;;  %v162_v3 = vld [vmem:[%s235_s0 + $0x8] sm:$0xf]  ;;  %v159_v4 = vld [vmem:[%s235_s0 + $0x14] sm:$0xf] }
   0x3   :  { %23 = vst [vmem:[#allocation1 + $0x18] sm:$0xf] %v161_v1  ;;  %v163_v5 = vld [vmem:[%s235_s0 + $0x4] sm:$0xf]  ;;  %v160_v6 = vld [vmem:[%s235_s0 + $0x10] sm:$0xf] }
   0x4   :  { %11 = vst [vmem:[#allocation1 + $0x30] sm:$0xf] %v158_v2  ;;  %v32_v7 = vld [vmem:[%s235_s0] sm:$0xf]  ;;  %s175_s0 = smov 33   ;;  %s178_s24 = smov 30  }
   0x5   :  { %27 = vst [vmem:[#allocation1 + $0x10] sm:$0xf] %v162_v3  ;;  %s179_s25 = smov 24   ;;  %s180_s26 = smov 18   ;;  %vm69_vm4 = vcmask 244952   ;;  %vm79_vm5 = vcmask 220352  }
   0x6   :  { %15 = vst [vmem:[#allocation1 + $0x28] sm:$0xf] %v159_v4  ;;  %s181_s27 = smov 15   ;;  %s182_s28 = smov 12   ;;  %vm89_vm6 = vcmask 195752   ;;  %vm99_vm7 = vcmask 171152  }
   0x7   :  { %31 = vst [vmem:[#allocation1 + $0x8] sm:$0xf] %v163_v5  ;;  %s183_s29 = smov 9   ;;  %s184_s30 = smov 6   ;;  %vm109_vm8 = vcmask 146552   ;;  %vm119_vm9 = vcmask 121952  }
   0x8   :  { %19 = vst [vmem:[#allocation1 + $0x20] sm:$0xf] %v160_v6  ;;  %s185_s2 = smov 3   ;;  %vm129_vm10 = vcmask 97352   ;;  %vm139_vm11 = vcmask 72752   ;;  %vm149_vm12 = vcmask 48152  }
   0x9   :  { %v44_v8 = vld [vmem:[#allocation1 + $0x39] sm:$0x2]   ;;  %v64_v9 = vld [vmem:[#allocation1 + $0x37] sm:$0x2]   ;;  %33 = vst [vmem:[#allocation1] sm:$0xf] %v32_v7 }
   0xa   :  { %v42_v10 = vld [vmem:[#allocation1 + $0x1a] sm:$0x1]   ;;  %v62_v11 = vld [vmem:[#allocation1 + $0x18] sm:$0x1]   ;;  %v54_v16 = vld [vmem:[#allocation1 + $0x38] sm:$0x2]  }
   0xb   :  { %v46_v12 = vsel %vm37_vm0, %v44_v8, %v42_v10  ;;  %v66_v13 = vsel %vm37_vm0, %v64_v9, %v62_v11  ;;  %v84_v14 = vld [vmem:[#allocation1 + $0x30] sm:$0x2]   ;;  %v52_v18 = vld [vmem:[#allocation1 + $0x19] sm:$0x1]   ;;  %v74_v20 = vld [vmem:[#allocation1 + $0x31] sm:$0x2]  }
   0xc   :  { %47 = vrot.lane.b32.xlu0 %v46_v12, %s175_s0  ;;  %67 = vrot.lane.b32.xlu1 %v66_v13, %s176_s22  ;;  %v82_v15 = vld [vmem:[#allocation1 + $0x11] sm:$0x1]   ;;  %v72_v19 = vld [vmem:[#allocation1 + $0x12] sm:$0x1]   ;;  %v92_v21 = vld [vmem:[#allocation1 + $0x10] sm:$0x1]   ;;  %v56_v24 = vsel %vm37_vm0, %v54_v16, %v52_v18 }
   0xd   :  { %v86_v17 = vsel %vm37_vm0, %v84_v14, %v82_v15  ;;  %v94_v22 = vld [vmem:[#allocation1 + $0x2f] sm:$0x2]   ;;  %v76_v25 = vsel %vm37_vm0, %v74_v20, %v72_v19  ;;  %v104_v29 = vld [vmem:[#allocation1 + $0x29] sm:$0x2]   ;;  %v114_v32 = vld [vmem:[#allocation1 + $0x28] sm:$0x2]  }
   0xe   :  { %87 = vrot.lane.b32.xlu2 %v86_v17, %s177_s23  ;;  %v96_v27 = vsel %vm37_vm0, %v94_v22, %v92_v21  ;;  %v102_v30 = vld [vmem:[#allocation1 + $0xa] sm:$0x1]   ;;  %v112_v31 = vld [vmem:[#allocation1 + $0x9] sm:$0x1]   ;;  %v122_v33 = vld [vmem:[#allocation1 + $0x8] sm:$0x1]  }
   0xf   :  { %v36_v23 = vld [vmem:[#allocation1 + $0x1f] sm:$0x2]   ;;  %v124_v34 = vld [vmem:[#allocation1 + $0x27] sm:$0x2]   ;;  %v106_v35 = vsel %vm37_vm0, %v104_v29, %v102_v30  ;;  %v116_v36 = vsel %vm37_vm0, %v114_v32, %v112_v31  ;;  %v134_v38 = vld [vmem:[#allocation1 + $0x21] sm:$0x2]  }
  0x10   :  { %v34_v26 = vld [vmem:[#allocation1] sm:$0x1]   ;;  %v126_v37 = vsel %vm37_vm0, %v124_v34, %v122_v33  ;;  %v132_v39 = vld [vmem:[#allocation1 + $0x2] sm:$0x1]   ;;  %v142_v40 = vld [vmem:[#allocation1 + $0x1] sm:$0x1]  }
  0x11   :  { %v38_v28 = vsel %vm37_vm0, %v36_v23, %v34_v26  ;;  %v144_v41 = vld [vmem:[#allocation1 + $0x20] sm:$0x2]   ;;  %v136_v42 = vsel %vm37_vm0, %v134_v38, %v132_v39 }
  0x12   :  { %40 = vst.msk [vmem:[#allocation0] sm:$0x3] %vm39_vm1, %v38_v28   ;;  %v146_v43 = vsel %vm37_vm0, %v144_v41, %v142_v40 }
  0x14   :  { %57 = vrot.lane.b32.xlu0 %v56_v24, %s178_s24  ;;  %77 = vrot.lane.b32.xlu1 %v76_v25, %s179_s25 }
  0x16   :  { %97 = vrot.lane.b32.xlu2 %v96_v27, %s180_s26 }
  0x1c   :  { %107 = vrot.lane.b32.xlu0 %v106_v35, %s181_s27  ;;  %117 = vrot.lane.b32.xlu1 %v116_v36, %s182_s28 }
  0x1e   :  { %127 = vrot.lane.b32.xlu2 %v126_v37, %s183_s29 }
  0x24   :  { %137 = vrot.lane.b32.xlu0 %v136_v42, %s184_s30  ;;  %147 = vrot.lane.b32.xlu1 %v146_v43, %s185_s2 }
  0x68   :  { %v88_v44 = vpop.permute.xlu2 %87  }
  0x70   :  { %v98_v45 = vpop.permute.xlu2 %97  }
  0x78   :  { %v128_v46 = vpop.permute.xlu2 %127  }
  0x7e   :  { %v48_v47 = vpop.permute.xlu0 %47   ;;  %v68_v48 = vpop.permute.xlu1 %67  }
  0x7f   :  { %50 = vst.msk [vmem:[#allocation0] sm:$0x3] %vm49_vm2, %v48_v47  }
  0x86   :  { %v58_v49 = vpop.permute.xlu0 %57   ;;  %v78_v50 = vpop.permute.xlu1 %77  }
  0x87   :  { %60 = vst.msk [vmem:[#allocation0] sm:$0x3] %vm59_vm3, %v58_v49  }
  0x88   :  { %70 = vst.msk [vmem:[#allocation0] sm:$0x3] %vm69_vm4, %v68_v48  }
  0x89   :  { %80 = vst.msk [vmem:[#allocation0] sm:$0x3] %vm79_vm5, %v78_v50  }
  0x8a   :  { %90 = vst.msk [vmem:[#allocation0] sm:$0x3] %vm89_vm6, %v88_v44  }
  0x8b   :  { %100 = vst.msk [vmem:[#allocation0] sm:$0x3] %vm99_vm7, %v98_v45  }
  0x8e   :  { %v108_v51 = vpop.permute.xlu0 %107   ;;  %v118_v52 = vpop.permute.xlu1 %117  }
  0x8f   :  { %110 = vst.msk [vmem:[#allocation0] sm:$0x3] %vm109_vm8, %v108_v51  }
  0x90   :  { %120 = vst.msk [vmem:[#allocation0] sm:$0x3] %vm119_vm9, %v118_v52  }
  0x91   :  { %130 = vst.msk [vmem:[#allocation0] sm:$0x3] %vm129_vm10, %v128_v46  }
  0x96   :  { %v138_v53 = vpop.permute.xlu0 %137   ;;  %v148_v54 = vpop.permute.xlu1 %147  }
  0x97   :  { %140 = vst.msk [vmem:[#allocation0] sm:$0x3] %vm139_vm11, %v138_v53  }
  0x98   :  { %150 = vst.msk [vmem:[#allocation0] sm:$0x3] %vm149_vm12, %v148_v54  }
  0x9f   :  { %v153_v55 = vld [vmem:[#allocation0] sm:$0x3] }
  0xa0   :  { %156 = vst [vmem:[%s236_s1] sm:$0x3] %v153_v55 }

// kernel: frequency_selection.1
= control target key start
LH: loop header
LB: loop body
LE: loop exit
PB: predicated region body
PF: predicated region fallthrough
CT: control target
= control target key end

     0   :  { %vm44_vm0 = vcmask 1044480   ;;  %vm40_vm1 = vcmask 302080   ;;  %s707_s1 = inlined_call_operand.vmem [shape: f32[37,512], index: 1, kind: input, shape index: {}]   ;;  %s708_s2 = inlined_call_operand.vmem [shape: bf16[256,256], index: 2, kind: input, shape index: {}]   ;;  %s709_s3 = inlined_call_operand.vmem [shape: f32[2,37], index: 3, kind: input, shape index: {}]   ;;  %s710_s0 = inlined_call_operand.vmem [shape: f32[8,256], index: 0, kind: input, shape index: {}]   ;;  %s711_s4 = inlined_call_operand.vmem [shape: f32[8,256], index: 4, kind: output, shape index: {}]  }
   0x1   :  { %v36_v0 = vld [vmem:[%s707_s1 + $0x80] sm:$0x1f]  ;;  %v37_v1 = vld [vmem:[%s707_s1 + $0x88] sm:$0x1f]  ;;  %v38_v2 = vld [vmem:[%s707_s1 + $0x90] sm:$0x1f] }
   0x2   :  { %422 = vmatpush.msk.msra.mxu0 %vm44_vm0, %v36_v0  ;;  %424 = vmatpush.msk.msra.mxu1 %vm44_vm0, %v37_v1  ;;  %v39_v3 = vld [vmem:[%s707_s1 + $0x98] sm:$0x1f]  ;;  %v32_v4 = vld [vmem:[%s707_s1 + $0x60] sm:$0xff]  ;;  %v33_v5 = vld [vmem:[%s707_s1 + $0x68] sm:$0xff] }
   0x3   :  { %426 = vmatpush.msk.msra.mxu2 %vm44_vm0, %v38_v2  ;;  %428 = vmatpush.msk.msra.mxu3 %vm44_vm0, %v39_v3  ;;  %v34_v6 = vld [vmem:[%s707_s1 + $0x70] sm:$0xff]  ;;  %v35_v7 = vld [vmem:[%s707_s1 + $0x78] sm:$0xff]  ;;  %v28_v8 = vld [vmem:[%s707_s1 + $0x40] sm:$0xff] }
   0x4   :  { %69 = vmatpush.msra.mxu0 %v32_v4  ;;  %89 = vmatpush.msra.mxu1 %v33_v5  ;;  %v29_v9 = vld [vmem:[%s707_s1 + $0x48] sm:$0xff]  ;;  %v30_v10 = vld [vmem:[%s707_s1 + $0x50] sm:$0xff]  ;;  %v31_v11 = vld [vmem:[%s707_s1 + $0x58] sm:$0xff] }
   0x5   :  { %109 = vmatpush.msra.mxu2 %v34_v6  ;;  %129 = vmatpush.msra.mxu3 %v35_v7  ;;  %v24_v12 = vld [vmem:[%s707_s1 + $0x20] sm:$0xff]  ;;  %v25_v13 = vld [vmem:[%s707_s1 + $0x28] sm:$0xff]  ;;  %v26_v14 = vld [vmem:[%s707_s1 + $0x30] sm:$0xff] }
   0x6   :  { %70 = vmatpush.msra.mxu0 %v28_v8  ;;  %90 = vmatpush.msra.mxu1 %v29_v9  ;;  %v27_v15 = vld [vmem:[%s707_s1 + $0x38] sm:$0xff]  ;;  %v20_v16 = vld [vmem:[%s707_s1] sm:$0xff]  ;;  %v21_v17 = vld [vmem:[%s707_s1 + $0x8] sm:$0xff] }
   0x7   :  { %110 = vmatpush.msra.mxu2 %v30_v10  ;;  %130 = vmatpush.msra.mxu3 %v31_v11  ;;  %v22_v18 = vld [vmem:[%s707_s1 + $0x10] sm:$0xff]  ;;  %v23_v19 = vld [vmem:[%s707_s1 + $0x18] sm:$0xff]  ;;  %v19_v22 = vld [vmem:[%s709_s3] sm:$0x3] }
   0x8   :  { %71 = vmatpush.msra.mxu0 %v24_v12  ;;  %91 = vmatpush.msra.mxu1 %v25_v13  ;;  %v152_v20 = vld [vmem:[%s708_s2 + $0x78] sm:$0xff]  ;;  %v151_v23 = vld [vmem:[%s708_s2 + $0x70] sm:$0xff]  ;;  %v150_v29 = vld [vmem:[%s708_s2 + $0x68] sm:$0xff] }
   0x9   :  { %v168_v21 = vld [vmem:[%s708_s2 + $0xf8] sm:$0xff]  ;;  %111 = vmatpush.msra.mxu2 %v26_v14  ;;  %131 = vmatpush.msra.mxu3 %v27_v15  ;;  %v167_v24 = vld [vmem:[%s708_s2 + $0xf0] sm:$0xff]  ;;  %v199_v25 = vunpack.c.l.bf16 %v152_v20  ;;  %v200_v27 = vunpack.c.h.bf16 %v152_v20  ;;  %v166_v30 = vld [vmem:[%s708_s2 + $0xe8] sm:$0xff]  ;;  %v197_v31 = vunpack.c.l.bf16 %v151_v23  ;;  %v198_v33 = vunpack.c.h.bf16 %v151_v23 }
   0xa   :  { %72 = vmatpush.msra.mxu0 %v20_v16  ;;  %92 = vmatpush.msra.mxu1 %v21_v17  ;;  %v231_v26 = vunpack.c.l.bf16 %v168_v21  ;;  %v232_v28 = vunpack.c.h.bf16 %v168_v21  ;;  %v229_v32 = vunpack.c.l.bf16 %v167_v24  ;;  %v230_v34 = vunpack.c.h.bf16 %v167_v24  ;;  %v149_v35 = vld [vmem:[%s708_s2 + $0x60] sm:$0xff]  ;;  %v148_v41 = vld [vmem:[%s708_s2 + $0x58] sm:$0xff]  ;;  %v147_v47 = vld [vmem:[%s708_s2 + $0x50] sm:$0xff] }
   0xb   :  { %112 = vmatpush.msra.mxu2 %v22_v18  ;;  %132 = vmatpush.msra.mxu3 %v23_v19  ;;  %v165_v36 = vld [vmem:[%s708_s2 + $0xe0] sm:$0xff]  ;;  %v195_v37 = vunpack.c.l.bf16 %v150_v29  ;;  %v227_v38 = vunpack.c.l.bf16 %v166_v30  ;;  %v196_v39 = vunpack.c.h.bf16 %v150_v29  ;;  %v228_v40 = vunpack.c.h.bf16 %v166_v30  ;;  %v164_v42 = vld [vmem:[%s708_s2 + $0xd8] sm:$0xff]  ;;  %v163_v48 = vld [vmem:[%s708_s2 + $0xd0] sm:$0xff] }
   0xc   :  { %423 = vmatmul.msk.f32.vlgmr.msra.gmra.mxu0 %vm40_vm1, %v19_v22  ;;  %425 = vmatmul.msk.f32.vlgmr.msra.gmra.mxu1 %vm40_vm1, %v19_v22  ;;  %v193_v43 = vunpack.c.l.bf16 %v149_v35  ;;  %v225_v44 = vunpack.c.l.bf16 %v165_v36  ;;  %v194_v45 = vunpack.c.h.bf16 %v149_v35  ;;  %v226_v46 = vunpack.c.h.bf16 %v165_v36  ;;  %v146_v53 = vld [vmem:[%s708_s2 + $0x48] sm:$0xff]  ;;  %v145_v59 = vld [vmem:[%s708_s2 + $0x40] sm:$0xff]  ;;  %v144_v1 = vld [vmem:[%s708_s2 + $0x38] sm:$0xff] }
   0xd   :  { %427 = vmatmul.msk.f32.vlgmr.msra.gmra.mxu2 %vm40_vm1, %v19_v22  ;;  %429 = vmatmul.msk.f32.vlgmr.msra.gmra.mxu3 %vm40_vm1, %v19_v22  ;;  %v191_v49 = vunpack.c.l.bf16 %v148_v41  ;;  %v223_v50 = vunpack.c.l.bf16 %v164_v42  ;;  %v192_v51 = vunpack.c.h.bf16 %v148_v41  ;;  %v224_v52 = vunpack.c.h.bf16 %v164_v42  ;;  %v162_v54 = vld [vmem:[%s708_s2 + $0xc8] sm:$0xff]  ;;  %v161_v60 = vld [vmem:[%s708_s2 + $0xc0] sm:$0xff]  ;;  %v160_v2 = vld [vmem:[%s708_s2 + $0xb8] sm:$0xff] }
   0xe   :  { %233 = vmatpush.msrb.mxu0 %v199_v25  ;;  %253 = vmatpush.msrb.mxu1 %v231_v26  ;;  %v189_v55 = vunpack.c.l.bf16 %v147_v47  ;;  %v221_v56 = vunpack.c.l.bf16 %v163_v48  ;;  %v190_v57 = vunpack.c.h.bf16 %v147_v47  ;;  %v222_v58 = vunpack.c.h.bf16 %v163_v48  ;;  %v143_v7 = vld [vmem:[%s708_s2 + $0x30] sm:$0xff]  ;;  %v142_v13 = vld [vmem:[%s708_s2 + $0x28] sm:$0xff]  ;;  %v141_v19 = vld [vmem:[%s708_s2 + $0x20] sm:$0xff] }
   0xf   :  { %273 = vmatpush.msrb.mxu2 %v200_v27  ;;  %293 = vmatpush.msrb.mxu3 %v232_v28  ;;  %v187_v61 = vunpack.c.l.bf16 %v146_v53  ;;  %v219_v62 = vunpack.c.l.bf16 %v162_v54  ;;  %v188_v63 = vunpack.c.h.bf16 %v146_v53  ;;  %v220_v0 = vunpack.c.h.bf16 %v162_v54  ;;  %v159_v8 = vld [vmem:[%s708_s2 + $0xb0] sm:$0xff]  ;;  %v158_v14 = vld [vmem:[%s708_s2 + $0xa8] sm:$0xff]  ;;  %v157_v20 = vld [vmem:[%s708_s2 + $0xa0] sm:$0xff] }
  0x10   :  { %234 = vmatpush.msrb.mxu0 %v197_v31  ;;  %254 = vmatpush.msrb.mxu1 %v229_v32  ;;  %v185_v3 = vunpack.c.l.bf16 %v145_v59  ;;  %v217_v4 = vunpack.c.l.bf16 %v161_v60  ;;  %v186_v5 = vunpack.c.h.bf16 %v145_v59  ;;  %v218_v6 = vunpack.c.h.bf16 %v161_v60  ;;  %v140_v25 = vld [vmem:[%s708_s2 + $0x18] sm:$0xff]  ;;  %v139_v31 = vld [vmem:[%s708_s2 + $0x10] sm:$0xff]  ;;  %v641_v53 = vld [vmem:[%s710_s0] sm:$0xff] }
  0x11   :  { %274 = vmatpush.msrb.mxu2 %v198_v33  ;;  %294 = vmatpush.msrb.mxu3 %v230_v34  ;;  %v183_v9 = vunpack.c.l.bf16 %v144_v1  ;;  %v215_v10 = vunpack.c.l.bf16 %v160_v2  ;;  %v184_v11 = vunpack.c.h.bf16 %v144_v1  ;;  %v216_v12 = vunpack.c.h.bf16 %v160_v2  ;;  %v156_v26 = vld [vmem:[%s708_s2 + $0x98] sm:$0xff]  ;;  %v155_v32 = vld [vmem:[%s708_s2 + $0x90] sm:$0xff]  ;;  %v646_v54 = vld [vmem:[%s710_s0 + $0x8] sm:$0xff] }
  0x12   :  { %235 = vmatpush.msrb.mxu0 %v195_v37  ;;  %255 = vmatpush.msrb.mxu1 %v227_v38  ;;  %v181_v15 = vunpack.c.l.bf16 %v143_v7  ;;  %v213_v16 = vunpack.c.l.bf16 %v159_v8  ;;  %v182_v17 = vunpack.c.h.bf16 %v143_v7  ;;  %v214_v18 = vunpack.c.h.bf16 %v159_v8  ;;  %v138_v37 = vld [vmem:[%s708_s2 + $0x8] sm:$0xff] }
  0x13   :  { %275 = vmatpush.msrb.mxu2 %v196_v39  ;;  %295 = vmatpush.msrb.mxu3 %v228_v40  ;;  %v179_v21 = vunpack.c.l.bf16 %v142_v13  ;;  %v211_v22 = vunpack.c.l.bf16 %v158_v14  ;;  %v180_v23 = vunpack.c.h.bf16 %v142_v13  ;;  %v212_v24 = vunpack.c.h.bf16 %v158_v14  ;;  %v154_v38 = vld [vmem:[%s708_s2 + $0x88] sm:$0xff] }
  0x14   :  { %236 = vmatpush.msrb.mxu0 %v193_v43  ;;  %256 = vmatpush.msrb.mxu1 %v225_v44  ;;  %v177_v27 = vunpack.c.l.bf16 %v141_v19  ;;  %v209_v28 = vunpack.c.l.bf16 %v157_v20  ;;  %v178_v29 = vunpack.c.h.bf16 %v141_v19  ;;  %v210_v30 = vunpack.c.h.bf16 %v157_v20  ;;  %v137_v43 = vld [vmem:[%s708_s2] sm:$0xff] }
  0x15   :  { %276 = vmatpush.msrb.mxu2 %v194_v45  ;;  %296 = vmatpush.msrb.mxu3 %v226_v46  ;;  %v175_v33 = vunpack.c.l.bf16 %v140_v25  ;;  %v207_v34 = vunpack.c.l.bf16 %v156_v26  ;;  %v176_v35 = vunpack.c.h.bf16 %v140_v25  ;;  %v208_v36 = vunpack.c.h.bf16 %v156_v26  ;;  %v153_v44 = vld [vmem:[%s708_s2 + $0x80] sm:$0xff] }
  0x16   :  { %237 = vmatpush.msrb.mxu0 %v191_v49  ;;  %257 = vmatpush.msrb.mxu1 %v223_v50  ;;  %v173_v39 = vunpack.c.l.bf16 %v139_v31  ;;  %v205_v40 = vunpack.c.l.bf16 %v155_v32  ;;  %v174_v41 = vunpack.c.h.bf16 %v139_v31  ;;  %v206_v42 = vunpack.c.h.bf16 %v155_v32 }
  0x17   :  { %277 = vmatpush.msrb.mxu2 %v192_v51  ;;  %297 = vmatpush.msrb.mxu3 %v224_v52  ;;  %v171_v45 = vunpack.c.l.bf16 %v138_v37  ;;  %v203_v46 = vunpack.c.l.bf16 %v154_v38  ;;  %v172_v47 = vunpack.c.h.bf16 %v138_v37  ;;  %v204_v48 = vunpack.c.h.bf16 %v154_v38 }
  0x18   :  { %238 = vmatpush.msrb.mxu0 %v189_v55  ;;  %258 = vmatpush.msrb.mxu1 %v221_v56  ;;  %v169_v49 = vunpack.c.l.bf16 %v137_v43  ;;  %v201_v50 = vunpack.c.l.bf16 %v153_v44  ;;  %v170_v51 = vunpack.c.h.bf16 %v137_v43  ;;  %v202_v52 = vunpack.c.h.bf16 %v153_v44 }
  0x19   :  { %278 = vmatpush.msrb.mxu2 %v190_v57  ;;  %298 = vmatpush.msrb.mxu3 %v222_v58 }
  0x1a   :  { %239 = vmatpush.msrb.mxu0 %v187_v61  ;;  %259 = vmatpush.msrb.mxu1 %v219_v62 }
  0x1b   :  { %279 = vmatpush.msrb.mxu2 %v188_v63  ;;  %299 = vmatpush.msrb.mxu3 %v220_v0 }
  0x1c   :  { %240 = vmatpush.msrb.mxu0 %v185_v3  ;;  %260 = vmatpush.msrb.mxu1 %v217_v4 }
  0x1d   :  { %280 = vmatpush.msrb.mxu2 %v186_v5  ;;  %300 = vmatpush.msrb.mxu3 %v218_v6 }
  0x1e   :  { %241 = vmatpush.msrb.mxu0 %v183_v9  ;;  %261 = vmatpush.msrb.mxu1 %v215_v10 }
  0x1f   :  { %281 = vmatpush.msrb.mxu2 %v184_v11  ;;  %301 = vmatpush.msrb.mxu3 %v216_v12 }
  0x20   :  { %242 = vmatpush.msrb.mxu0 %v181_v15  ;;  %262 = vmatpush.msrb.mxu1 %v213_v16 }
  0x21   :  { %282 = vmatpush.msrb.mxu2 %v182_v17  ;;  %302 = vmatpush.msrb.mxu3 %v214_v18 }
  0x22   :  { %243 = vmatpush.msrb.mxu0 %v179_v21  ;;  %263 = vmatpush.msrb.mxu1 %v211_v22 }
  0x23   :  { %283 = vmatpush.msrb.mxu2 %v180_v23  ;;  %303 = vmatpush.msrb.mxu3 %v212_v24 }
  0x24   :  { %244 = vmatpush.msrb.mxu0 %v177_v27  ;;  %264 = vmatpush.msrb.mxu1 %v209_v28 }
  0x25   :  { %284 = vmatpush.msrb.mxu2 %v178_v29  ;;  %304 = vmatpush.msrb.mxu3 %v210_v30 }
  0x26   :  { %245 = vmatpush.msrb.mxu0 %v175_v33  ;;  %265 = vmatpush.msrb.mxu1 %v207_v34 }
  0x27   :  { %285 = vmatpush.msrb.mxu2 %v176_v35  ;;  %305 = vmatpush.msrb.mxu3 %v208_v36 }
  0x28   :  { %246 = vmatpush.msrb.mxu0 %v173_v39  ;;  %266 = vmatpush.msrb.mxu1 %v205_v40 }
  0x29   :  { %286 = vmatpush.msrb.mxu2 %v174_v41  ;;  %306 = vmatpush.msrb.mxu3 %v206_v42 }
  0x2a   :  { %247 = vmatpush.msrb.mxu0 %v171_v45  ;;  %267 = vmatpush.msrb.mxu1 %v203_v46 }
  0x2b   :  { %287 = vmatpush.msrb.mxu2 %v172_v47  ;;  %307 = vmatpush.msrb.mxu3 %v204_v48 }
  0x2c   :  { %248 = vmatpush.msrb.mxu0 %v169_v49  ;;  %268 = vmatpush.msrb.mxu1 %v201_v50 }
  0x2d   :  { %288 = vmatpush.msrb.mxu2 %v170_v51  ;;  %308 = vmatpush.msrb.mxu3 %v202_v52 }
  0x2e   :  { %249 = vmatmul.f32.vlgmr.msrb.gmra.mxu0 %v641_v53  ;;  %269 = vmatmul.f32.vlgmr.msrb.gmra.mxu1 %v646_v54 }
  0x2f   :  { %289 = vmatmul.f32.vlgmr.msrb.gmra.mxu2 %v641_v53  ;;  %309 = vmatmul.f32.vlgmr.msrb.gmra.mxu3 %v646_v54 }
  0x89   :  { %v652_v55 = vpop.f32.mrf.mxu0  ;;  %v654_v56 = vpop.f32.mrf.mxu1 }
  0x8a   :  { %v430_v57 = vmul.f32 -1.442695, %v652_v55  ;;  %v431_v58 = vmul.f32 -1.442695, %v654_v56  ;;  %v406_v20 = vperm.slane %v652_v55, 1 }
  0x8c   :  { %434 = vpow2.f32 %v430_v57 }
  0x8d   :  { %436 = vpow2.f32 %v431_v58 }
  0x90   :  { %v658_v59 = vpop.f32.mrf.mxu2  ;;  %v660_v60 = vpop.f32.mrf.mxu3 }
  0x91   :  { %v432_v61 = vmul.f32 -1.442695, %v658_v59  ;;  %v433_v62 = vmul.f32 -1.442695, %v660_v60  ;;  %v408_v55 = vperm.slane %v658_v59, 1  ;;  %v409_v59 = vperm.slane %v660_v60, 1 }
  0x92   :  { %v435_v63 = vpop.eup %434 }
  0x93   :  { %v437_v0 = vpop.eup %436  ;;  %v325_v1 = vadd.f32 1.0, %v435_v63  ;;  %438 = vpow2.f32 %v432_v61 }
  0x94   :  { %v326_v2 = vadd.f32 1.0, %v437_v0  ;;  %440 = vpow2.f32 %v433_v62 }
  0x95   :  { %442 = vrcp.f32 %v325_v1  ;;  %vm334_vm2 = vweird.f32 %v325_v1  ;;  %v338_v14 = vand.u32 2147483647, %v325_v1  ;;  %v340_v15 = vand.u32 2147483648, %v325_v1 }
  0x96   :  { %444 = vrcp.f32 %v326_v2  ;;  %vm349_vm5 = vweird.f32 %v326_v2  ;;  %v353_v24 = vand.u32 2147483647, %v326_v2  ;;  %v355_v25 = vand.u32 2147483648, %v326_v2 }
  0x97   :  { %vm339_vm6 = vcmp.eq.f32.partialorder %v338_v14, 8.507059e+37  ;;  %v341_v28 = vor.u32 1.1754944e-38, %v340_v15 }
  0x98   :  { %vm682_vm12 = vcmp.eq.f32.partialorder %v353_v24, 8.507059e+37  ;;  %v356_v41 = vor.u32 1.1754944e-38, %v355_v25 }
  0x99   :  { %v439_v3 = vpop.eup %438 }
  0x9a   :  { %v441_v4 = vpop.eup %440  ;;  %v327_v5 = vadd.f32 1.0, %v439_v3  ;;  %v407_v3 = vperm.slane %v654_v56, 1 }
  0x9b   :  { %v443_v6 = vpop.eup %442  ;;  %v328_v7 = vadd.f32 1.0, %v441_v4 }
  0x9c   :  { %v664_v8 = vpop.eup %444  ;;  %v330_v9 = vmul.f32 %v443_v6, %v325_v1  ;;  %446 = vrcp.f32 %v327_v5  ;;  %vm335_vm3 = vweird.f32 %v443_v6  ;;  %v370_v30 = vand.u32 2147483648, %v327_v5 }
  0x9d   :  { %v345_v10 = vmul.f32 %v664_v8, %v326_v2  ;;  %448 = vrcp.f32 %v328_v7  ;;  %vm669_vm4 = vmor %vm334_vm2, %vm335_vm3  ;;  %vm350_vm7 = vweird.f32 %v664_v8  ;;  %v368_v33 = vand.u32 2147483647, %v327_v5 }
  0x9e   :  { %v331_v11 = vsub.f32 1.0, %v330_v9  ;;  %v385_v34 = vand.u32 2147483648, %v328_v7  ;;  %v383_v37 = vand.u32 2147483647, %v328_v7  ;;  %vm364_vm10 = vweird.f32 %v327_v5  ;;  %vm678_vm11 = vmor %vm349_vm5, %vm350_vm7 }
  0x9f   :  { %v346_v12 = vsub.f32 1.0, %v345_v10  ;;  %v371_v42 = vor.u32 1.1754944e-38, %v370_v30  ;;  %vm379_vm14 = vweird.f32 %v328_v7  ;;  %vm369_vm15 = vcmp.eq.f32.partialorder %v368_v33, 8.507059e+37 }
  0xa0   :  { %v332_v13 = vmul.f32 %v443_v6, %v331_v11  ;;  %v386_v49 = vor.u32 1.1754944e-38, %v385_v34  ;;  %vm384_vm1 = vcmp.eq.f32.partialorder %v383_v37, 8.507059e+37  ;;  %vm397_vm2 = vcmask 1043456  }
  0xa1   :  { %v347_v17 = vmul.f32 %v664_v8, %v346_v12  ;;  %v411_v14 = vsel %vm397_vm2, %v407_v3, %v409_v59 }
  0xa2   :  { %v447_v16 = vpop.eup %446  ;;  %v333_v18 = vadd.f32 %v443_v6, %v332_v13 }
  0xa3   :  { %v449_v19 = vpop.eup %448  ;;  %v360_v21 = vmul.f32 %v447_v16, %v327_v5  ;;  %v348_v31 = vadd.f32 %v664_v8, %v347_v17  ;;  %vm365_vm8 = vweird.f32 %v447_v16  ;;  %v410_v5 = vsel %vm397_vm2, %v406_v20, %v408_v55 }
  0xa4   :  { %v375_v22 = vmul.f32 %v449_v19, %v328_v7  ;;  %v337_v27 = vsel %vm669_vm4, %v443_v6, %v333_v18  ;;  %vm380_vm9 = vweird.f32 %v449_v19  ;;  %vm366_vm13 = vmor %vm364_vm10, %vm365_vm8 }
  0xa5   :  { %v361_v26 = vsub.f32 1.0, %v360_v21  ;;  %v342_v36 = vsel %vm339_vm6, %v341_v28, %v337_v27  ;;  %v352_v43 = vsel %vm678_vm11, %v664_v8, %v348_v31  ;;  %vm381_vm0 = vmor %vm379_vm14, %vm380_vm9 }
  0xa6   :  { %v376_v29 = vsub.f32 1.0, %v375_v22  ;;  %v389_v48 = vmul.f32 2.0, %v342_v36  ;;  %v357_v58 = vsel %vm682_vm12, %v356_v41, %v352_v43 }
  0xa7   :  { %v362_v32 = vmul.f32 %v447_v16, %v361_v26  ;;  %v390_v2 = vmul.f32 2.0, %v357_v58 }
  0xa8   :  { %v377_v35 = vmul.f32 %v449_v19, %v376_v29  ;;  %v393_v0 = vperm.slane %v389_v48, 0 }
  0xa9   :  { %v363_v38 = vadd.f32 %v447_v16, %v362_v32 }
  0xaa   :  { %v378_v44 = vadd.f32 %v449_v19, %v377_v35 }
  0xab   :  { %v250_v45 = vpop.f32.mrf.mxu0  ;;  %v270_v46 = vpop.f32.mrf.mxu1  ;;  %v367_v47 = vsel %vm366_vm13, %v447_v16, %v363_v38 }
  0xac   :  { %v271_v50 = vadd.f32 %v270_v46, %v250_v45  ;;  %v372_v51 = vsel %vm369_vm15, %v371_v42, %v367_v47  ;;  %v382_v52 = vsel %vm381_vm0, %v449_v19, %v378_v44 }
  0xad   :  { %v391_v57 = vmul.f32 2.0, %v372_v51  ;;  %v387_v61 = vsel %vm384_vm1, %v386_v49, %v382_v52 }
  0xae   :  { %v400_v62 = vsub.f32 %v641_v53, %v271_v50  ;;  %v392_v63 = vmul.f32 2.0, %v387_v61  ;;  %v412_v7 = vmul.f32 %v410_v5, %v271_v50  ;;  %v394_v53 = vperm.slane %v390_v2, 0 }
  0xaf   :  { %v395_v1 = vperm.slane %v391_v57, 0 }
  0xb0   :  { %v396_v10 = vperm.slane %v392_v63, 0 }
  0xb1   :  { %v398_v4 = vsel %vm397_vm2, %v393_v0, %v395_v1 }
  0xb2   :  { %v402_v6 = vmul.f32 %v400_v62, %v398_v4  ;;  %v290_v8 = vpop.f32.mrf.mxu2  ;;  %v310_v9 = vpop.f32.mrf.mxu3  ;;  %v399_v56 = vsel %vm397_vm2, %v394_v53, %v396_v10 }
  0xb3   :  { %v311_v11 = vadd.f32 %v310_v9, %v290_v8 }
  0xb4   :  { %v414_v12 = vadd.f32 %v412_v7, %v402_v6 }
  0xb5   :  { %v401_v13 = vsub.f32 %v646_v54, %v311_v11  ;;  %v413_v60 = vmul.f32 %v411_v14, %v311_v11 }
  0xb6   :  { %416 = vst [vmem:[%s711_s4] sm:$0xff] %v414_v12 }
  0xb7   :  { %v403_v15 = vmul.f32 %v401_v13, %v399_v56 }
  0xb9   :  { %v415_v16 = vadd.f32 %v413_v60, %v403_v15 }
  0xbb   :  { %417 = vst [vmem:[%s711_s4 + $0x8] sm:$0xff] %v415_v16 }

</bundles_post_ra>
